<compile_context>
chip_gen: v7x
topology: tpu7x:2x2x1
jax: 0.10.0
libtpu: 0.0.40
codegen_flags: <defaults>
</compile_context>

<pallas_src>
import jax
import jax.numpy as jnp
from jax.experimental import pallas as pl
from jax.experimental.pallas import tpu as pltpu

_LANES = 128
_SUBLANES = 8
_VMEM_LIMIT_BYTES = 32 << 20    # explicit scoped-VMEM limit; safe on v5e/v6e/v7x
_VMEM_BUDGET_BYTES = 16 << 20   # target working set (~half the limit, headroom)
_MIN_ROWS_PER_SPLIT = 1024      # only split a 1-step grid (for v7x megacore) if halves stay big


def _round_up(v, m):
    return ((v + m - 1) // m) * m


def _pick_tile_n(n_rows, c, k, itemsize):
    """Pick the row-tile size from a VMEM budget, with 128-lane padding in mind."""
    # Per-row footprint: x block (C padded to 128 lanes) + out block (K padded to 128
    # lanes), each double-buffered by the Pallas pipeline.
    bytes_per_row = (_round_up(c, _LANES) + _round_up(k, _LANES)) * itemsize * 2
    # Resident weight (+bias) blocks; assume 2 buffers to be conservative.
    fixed = (_round_up(c, _SUBLANES) * _round_up(k, _LANES)
             + _round_up(k, _LANES)) * itemsize * 2
    budget = max(_VMEM_BUDGET_BYTES - fixed, 1 << 20)
    cap = max(_SUBLANES, (budget // bytes_per_row) // _SUBLANES * _SUBLANES)
    if n_rows <= cap:
        # Whole batch fits one step.  On v7x a >=2-step grid lets
        # dimension_semantics=("parallel",) use both TensorCores; only worth it
        # when each half still amortizes the ~0.35 us per-step overhead.
        if n_rows >= 2 * _MIN_ROWS_PER_SPLIT:
            return _round_up(-(-n_rows // 2), _SUBLANES)
        return n_rows
    return int(cap)


def _linear_kernel(x_ref, w_ref, b_ref, o_ref):
    # x: (TILE_N, C), w: (C, K) -- pre-transposed, MXU-native --, b: (1, K) f32
    acc = jnp.dot(x_ref[...], w_ref[...], preferred_element_type=jnp.float32)
    o_ref[...] = (acc + b_ref[...]).astype(o_ref.dtype)


def classifier_1fc(x, weight, bias, droprate=0.0, tile_n=None, compute_dtype=None):
    """Forward of Classifier_1fc.

    x:      (N, n_channels)
    weight: (n_classes, n_channels)   (same layout as nn.Linear.weight)
    bias:   (n_classes,)
    tile_n: optional explicit row-tile override (auto-sized from VMEM budget if None)
    compute_dtype: optional (e.g. jnp.bfloat16) cast of x/weight for 2x less HBM read;
                   accumulation stays f32, output keeps x's original dtype.
    """
    # TODO(synk): dropout (droprate != 0.0) not implemented — the default module
    # config uses droprate=0.0, so the forward pass is exactly the Linear layer.
    assert droprate == 0.0, "dropout path not implemented"

    N, C = x.shape
    K, C2 = weight.shape
    assert C == C2 and bias.shape == (K,)

    out_dtype = x.dtype
    if compute_dtype is not None:
        x = x.astype(compute_dtype)
        weight = weight.astype(compute_dtype)

    # One-time layout work in the wrapper (outside the kernel):
    w_t = weight.T                                  # (C, K): contraction on sublanes
    bias2d = bias.reshape(1, K).astype(jnp.float32)

    itemsize = jnp.dtype(x.dtype).itemsize
    if tile_n is None:
        tile_n = _pick_tile_n(N, C, K, itemsize)
    tile_n = min(int(tile_n), N)
    # (8,128) rule: TILE_N must be a multiple of 8 or equal to N.
    if tile_n != N and tile_n % _SUBLANES != 0:
        tile_n = max(_SUBLANES, (tile_n // _SUBLANES) * _SUBLANES)
    grid_n = pl.cdiv(N, tile_n)

    return pl.pallas_call(
        _linear_kernel,
        out_shape=jax.ShapeDtypeStruct((N, K), out_dtype),
        grid=(grid_n,),
        in_specs=[
            pl.BlockSpec((tile_n, C), lambda i: (i, 0)),  # stream x over N
            pl.BlockSpec((C, K), lambda i: (0, 0)),       # weight resident in VMEM
            pl.BlockSpec((1, K), lambda i: (0, 0)),       # bias resident in VMEM
        ],
        out_specs=pl.BlockSpec((tile_n, K), lambda i: (i, 0)),
        compiler_params=pltpu.CompilerParams(
            dimension_semantics=("parallel",),            # megacore-shard N on v7x
            vmem_limit_bytes=_VMEM_LIMIT_BYTES),
    )(x, w_t, bias2d)


if __name__ == "__main__":
    key = jax.random.PRNGKey(0)
    kx, kw, kb = jax.random.split(key, 3)

    n_channels = 32   # input feature dim
    n_classes = 8     # output classes

    # Deterministic parameter init (mimics nn.Linear uniform(-1/sqrt(C), 1/sqrt(C)))
    bound = 1.0 / (n_channels ** 0.5)
    weight = jax.random.uniform(kw, (n_classes, n_channels),
                                minval=-bound, maxval=bound, dtype=jnp.float32)
    bias = jax.random.uniform(kb, (n_classes,),
                              minval=-bound, maxval=bound, dtype=jnp.float32)

    # 1) Small batch — single grid step, whole problem VMEM-resident.
    N = 16
    x = jax.random.normal(kx, (N, n_channels), dtype=jnp.float32)
    out = jax.block_until_ready(classifier_1fc(x, weight, bias, droprate=0.0))
    ref = x @ weight.T + bias
    assert out.shape == (N, n_classes)
    assert jnp.allclose(out, ref, atol=1e-5, rtol=1e-5), "mismatch (small, 1-step)"

    # 2) Large batch — auto-sized tile splits into >=2 parallel steps (v7x megacore).
    N2 = 4096
    x2 = jax.random.normal(kx, (N2, n_channels), dtype=jnp.float32)
    out2 = jax.block_until_ready(classifier_1fc(x2, weight, bias))
    ref2 = x2 @ weight.T + bias
    assert out2.shape == (N2, n_classes)
    assert jnp.allclose(out2, ref2, atol=1e-5, rtol=1e-5), "mismatch (large, tiled)"

    # 3) Ragged last tile: N not a multiple of tile_n (OOB output rows discarded).
    N3 = 1000
    x3 = jax.random.normal(kx, (N3, n_channels), dtype=jnp.float32)
    out3 = jax.block_until_ready(classifier_1fc(x3, weight, bias, tile_n=384))
    ref3 = x3 @ weight.T + bias
    assert out3.shape == (N3, n_classes)
    assert jnp.allclose(out3, ref3, atol=1e-5, rtol=1e-5), "mismatch (ragged tile)"

    # 4) Optional bf16-input path (halves HBM read; f32 accumulation retained).
    out4 = jax.block_until_ready(
        classifier_1fc(x2, weight, bias, compute_dtype=jnp.bfloat16))
    assert out4.dtype == jnp.float32
    assert jnp.allclose(out4, ref2, atol=1e-1, rtol=1e-1), "mismatch (bf16 inputs)"

    print("KERNEL_OK")
</pallas_src>

<mosaic_0001>
module attributes {stable_mosaic.version = 11 : i64} {
  func.func @_linear_kernel(%arg0: i32, %arg1: memref<16x32xf32, #tpu.memory_space<vmem>>, %arg2: memref<32x8xf32, #tpu.memory_space<vmem>>, %arg3: memref<1x8xf32, #tpu.memory_space<vmem>>, %arg4: memref<16x8xf32, #tpu.memory_space<vmem>>) attributes {dimension_semantics = [#tpu.dimension_semantics<parallel>], iteration_bounds = array<i64: 1>, scalar_prefetch = 0 : i64, scratch_operands = 0 : i64, tpu.core_type = #tpu.core_type<tc>, window_params = [{transform_indices = @transform_0, window_bounds = array<i64: 16, 32>}, {pipeline_mode = #tpu.pipeline_mode<synchronous>, transform_indices = @transform_1, window_bounds = array<i64: 32, 8>}, {pipeline_mode = #tpu.pipeline_mode<synchronous>, transform_indices = @transform_2, window_bounds = array<i64: 1, 8>}, {transform_indices = @transform_3, window_bounds = array<i64: 16, 8>}]} {
    %c0 = arith.constant 0 : index
    %c0_0 = arith.constant 0 : index
    %0 = vector.load %arg1[%c0, %c0_0] : memref<16x32xf32, #tpu.memory_space<vmem>>, vector<16x32xf32>
    %c0_1 = arith.constant 0 : index
    %c0_2 = arith.constant 0 : index
    %1 = vector.load %arg2[%c0_1, %c0_2] : memref<32x8xf32, #tpu.memory_space<vmem>>, vector<32x8xf32>
    %cst = arith.constant dense<0.000000e+00> : vector<16x8xf32>
    %2 = tpu.matmul %0, %1, %cst {dimension_numbers = #tpu.dot_dimension_numbers<[1], [0], [0], [1], [0, 0, 1, 1], [], []>} : vector<16x32xf32>, vector<32x8xf32>, vector<16x8xf32> -> vector<16x8xf32>
    %c0_3 = arith.constant 0 : index
    %c0_4 = arith.constant 0 : index
    %3 = vector.load %arg3[%c0_3, %c0_4] : memref<1x8xf32, #tpu.memory_space<vmem>>, vector<1x8xf32>
    %4 = vector.broadcast %3 : vector<1x8xf32> to vector<16x8xf32>
    %5 = arith.addf %2, %4 : vector<16x8xf32>
    %c0_5 = arith.constant 0 : index
    %c0_6 = arith.constant 0 : index
    %6 = vector.load %arg4[%c0_5, %c0_6] : memref<16x8xf32, #tpu.memory_space<vmem>>, vector<16x8xf32>
    tpu.vector_store %arg4[%c0_5, %c0_6], %5 {strides = array<i32>} : memref<16x8xf32, #tpu.memory_space<vmem>>, vector<16x8xf32>,
    return
  }
  func.func @transform_0(%arg0: i32) -> (i32, i32) {
    %c0_i32 = arith.constant 0 : i32
    %c0_i32_0 = arith.constant 0 : i32
    return %arg0, %c0_i32 : i32, i32
  }
  func.func @transform_1(%arg0: i32) -> (i32, i32) {
    %c0_i32 = arith.constant 0 : i32
    %c0_i32_0 = arith.constant 0 : i32
    %c0_i32_1 = arith.constant 0 : i32
    return %c0_i32, %c0_i32_0 : i32, i32
  }
  func.func @transform_2(%arg0: i32) -> (i32, i32) {
    %c0_i32 = arith.constant 0 : i32
    %c0_i32_0 = arith.constant 0 : i32
    %c0_i32_1 = arith.constant 0 : i32
    return %c0_i32, %c0_i32_0 : i32, i32
  }
  func.func @transform_3(%arg0: i32) -> (i32, i32) {
    %c0_i32 = arith.constant 0 : i32
    %c0_i32_0 = arith.constant 0 : i32
    return %arg0, %c0_i32 : i32, i32
  }
}

</mosaic_0001>

<bundles_post_ra>
// kernel: tpu_custom_call.1
= control target key start
LH: loop header
LB: loop body
LE: loop exit
PB: predicated region body
PF: predicated region fallthrough
CT: control target
= control target key end

     0   :  { %vm27_vm0 = vcmask 261120   ;;  %vm109_vm1 = vcmask 64512   ;;  %s191_s1 = inlined_call_operand.vmem [shape: f32[32,8], index: 1, kind: input, shape index: {}]   ;;  %s192_s0 = inlined_call_operand.vmem [shape: f32[16,32], index: 0, kind: input, shape index: {}]   ;;  %s193_s2 = inlined_call_operand.vmem [shape: f32[1,8], index: 2, kind: input, shape index: {}]   ;;  %s194_s3 = inlined_call_operand.vmem [shape: f32[16,8], index: 3, kind: output, shape index: {}]  }
   0x1   :  { %v16_v0 = vld [vmem:[%s191_s1] sm:$0xff]  ;;  %v17_v1 = vld [vmem:[%s191_s1 + $0x8] sm:$0xff]  ;;  %v18_v2 = vld [vmem:[%s191_s1 + $0x10] sm:$0xff] }
   0x2   :  { %v136_v3 = vpack.c.bf16 %v17_v1, %v16_v0  ;;  %v19_v4 = vld [vmem:[%s191_s1 + $0x18] sm:$0xff]  ;;  %v14_v5 = vld [vmem:[%s192_s0] sm:$0xff]  ;;  %v15_v7 = vld [vmem:[%s192_s0 + $0x8] sm:$0xff] }
   0x3   :  { %v140_v6 = vpack.c.bf16 %v19_v4, %v18_v2  ;;  %133 = vmatprep.mubr.msk.f32.mxu0 %vm27_vm0, %v14_v5  ;;  %v116_v8 = vld [vmem:[%s193_s2] ss:$0 sm:$0xff] }
   0x4   :  { %137 = vmatprep.subr.bf16.mxu0 %v136_v3 }
   0x5   :  { %139 = vmatpush3.bf16.msra.mxu0 %v136_v3 }
   0x6   :  { %141 = vmatprep.subr.bf16.mxu0 %v140_v6 }
   0x9   :  { %143 = vmatpush3.bf16.msra.mxu0 %v140_v6 }
   0xc   :  { %134 = vmatmul.mubr.msk.f32.vlgmr.msra.gmra.mrb[0].mxu0 %vm27_vm0, %v15_v7 }
  0xdf   :  { %v135_v9 = vpop.f32.mrb[0].mxu0 }
  0xe0   :  { %v106_v10 = vadd.f32 %v135_v9, %v116_v8  ;;  %v100_v11 = vpop.f32.mrb[1].mxu0 }
  0xe1   :  { %v101_v12 = vadd.f32 %v116_v8, %v100_v11 }
  0xe2   :  { %111 = vst.msk [vmem:[%s194_s3 + $0x8] sm:$0xff] %vm109_vm1, %v106_v10 }
  0xe3   :  { %110 = vst.msk [vmem:[%s194_s3] sm:$0xff] %vm109_vm1, %v101_v12 }

</bundles_post_ra>
